<compile_context>
chip_gen: v5e
topology: v5e:2x2
jax: 0.10.0
libtpu: 0.0.40
codegen_flags: <defaults>
</compile_context>

<pallas_src>
import functools

import jax
import jax.numpy as jnp
from jax import lax
from jax.experimental import pallas as pl
from jax.experimental.pallas import tpu as pltpu

EPS = 1e-5
NEG_SLOPE = 0.01
_LANE = 128


def _round_up(a, b):
    return (a + b - 1) // b * b


def _conv_in_lrelu_kernel(x_ref, w_ref, g_ref, b_ref, o_ref,
                          sum_ref, ssq_ref, scale_ref, shift_ref,
                          *, inv_count):
    # x_ref : (1, C_in, tile_S)   w_ref : (C_out, C_in)
    # g/b   : (C_out, 1)          o_ref : (1, C_out, tile_S)
    # scratch refs: (C_out, 1) f32 each, persistent across the grid.
    p = pl.program_id(1)            # 0 = stats pass, 1 = normalize/write pass
    s = pl.program_id(2)            # spatial tile index
    n_s = pl.num_programs(2)

    # 1x1x1 Conv3d == channel matmul on this spatial tile.  Conv bias is
    # omitted: a per-channel constant is cancelled exactly by InstanceNorm.
    y = jnp.dot(w_ref[...], x_ref[0],
                preferred_element_type=jnp.float32)          # (C_out, tile_S)

    @pl.when(p == 0)
    def _stats():
        @pl.when(s == 0)
        def _init():
            sum_ref[...] = jnp.zeros_like(sum_ref)
            ssq_ref[...] = jnp.zeros_like(ssq_ref)

        # Single sweep: sum and sum-of-squares (XLU reductions, no big temps).
        sum_ref[...] += jnp.sum(y, axis=1, keepdims=True)
        ssq_ref[...] += jnp.sum(y * y, axis=1, keepdims=True)

        @pl.when(s == n_s - 1)
        def _finalize():
            mean = sum_ref[...] * inv_count
            var = jnp.maximum(ssq_ref[...] * inv_count - mean * mean, 0.0)
            scale = g_ref[...] * lax.rsqrt(var + EPS)
            scale_ref[...] = scale
            shift_ref[...] = b_ref[...] - scale * mean

    @pl.when(p == 1)
    def _apply():
        # Folded InstanceNorm + affine: one mul + one add per element.
        z = y * scale_ref[...] + shift_ref[...]
        o_ref[0] = jnp.where(z >= 0, z, NEG_SLOPE * z).astype(o_ref.dtype)


def conv3d_norm_act(x_ncdhw, weight, bias, gamma, beta, *, tile_s=None):
    """Conv3d(1x1x1) -> InstanceNorm3d(affine=True) -> LeakyReLU(0.01).

    x_ncdhw: (N, C_in, D, H, W) f32; weight: (C_out, C_in, 1, 1, 1);
    bias/gamma/beta: (C_out,).  `bias` is accepted for API parity but unused:
    InstanceNorm's mean subtraction cancels any per-channel constant exactly.
    """
    del bias  # mathematically a no-op before InstanceNorm
    N, C_in, D, H, W = x_ncdhw.shape
    C_out = weight.shape[0]
    S = D * H * W

    # Lane-dense spatial tiling; cap the tile so double-buffered blocks stay
    # well inside every generation's VMEM budget.
    if tile_s is None:
        tile_s = min(_round_up(S, _LANE), 2048)
    tile_s = _round_up(tile_s, _LANE)
    S_pad = _round_up(S, tile_s)
    n_s = S_pad // tile_s

    x = x_ncdhw.reshape(N, C_in, S)
    if S_pad != S:
        x = jnp.pad(x, ((0, 0), (0, 0), (0, S_pad - S)))

    w2d = weight.reshape(C_out, C_in).astype(jnp.float32)
    g2d = gamma.reshape(C_out, 1).astype(jnp.float32)
    beta2d = beta.reshape(C_out, 1).astype(jnp.float32)

    kernel = functools.partial(_conv_in_lrelu_kernel, inv_count=1.0 / S)

    out = pl.pallas_call(
        kernel,
        out_shape=jax.ShapeDtypeStruct((N, C_out, S_pad), x.dtype),
        grid_spec=pltpu.PrefetchScalarGridSpec(
            num_scalar_prefetch=0,
            # (batch, pass, spatial tile): pass 0 = stats, pass 1 = write.
            grid=(N, 2, n_s),
            in_specs=[
                pl.BlockSpec((1, C_in, tile_s), lambda n, p, s: (n, 0, s)),
                pl.BlockSpec((C_out, C_in), lambda n, p, s: (0, 0)),
                pl.BlockSpec((C_out, 1), lambda n, p, s: (0, 0)),
                pl.BlockSpec((C_out, 1), lambda n, p, s: (0, 0)),
            ],
            # Pin the output block to (n, 0, 0) during pass 0 so no HBM
            # writeback happens until pass 1 produces real data.
            out_specs=pl.BlockSpec((1, C_out, tile_s),
                                   lambda n, p, s: (n, 0, p * s)),
            scratch_shapes=[
                pltpu.VMEM((C_out, 1), jnp.float32),   # per-channel sum
                pltpu.VMEM((C_out, 1), jnp.float32),   # per-channel sum of squares
                pltpu.VMEM((C_out, 1), jnp.float32),   # folded scale
                pltpu.VMEM((C_out, 1), jnp.float32),   # folded shift
            ],
        ),
        compiler_params=pltpu.CompilerParams(
            dimension_semantics=("parallel", "arbitrary", "arbitrary"),
            vmem_limit_bytes=32 * 1024 * 1024,
        ),
    )(x, w2d, g2d, beta2d)

    # TODO(synk): for N == 1 on v7x, add a second "parallel" split (e.g. over
    # spatial halves with a partial-stat merge) so both TensorCores are used.
    return out[:, :, :S].reshape(N, C_out, D, H, W)


def reference(x_ncdhw, weight, bias, gamma, beta):
    """Plain-JAX reference of Conv3d(1x1x1)->InstanceNorm3d(affine)->LeakyReLU,
    faithful to the PyTorch module (bias included)."""
    N, C_in, D, H, W = x_ncdhw.shape
    C_out = weight.shape[0]
    x = x_ncdhw.reshape(N, C_in, -1)
    y = jnp.einsum("oc,ncs->nos", weight.reshape(C_out, C_in), x) + bias[None, :, None]
    mean = jnp.mean(y, axis=2, keepdims=True)
    var = jnp.mean((y - mean) ** 2, axis=2, keepdims=True)
    y_hat = (y - mean) / jnp.sqrt(var + EPS)
    z = gamma[None, :, None] * y_hat + beta[None, :, None]
    out = jnp.where(z >= 0, z, NEG_SLOPE * z)
    return out.reshape(N, C_out, D, H, W)


def _make_params(key, C_in, C_out):
    kw, kb = jax.random.split(key)
    fan_in = C_in  # kernel_size (1,1,1)
    bound = 1.0 / jnp.sqrt(fan_in)
    weight = jax.random.uniform(kw, (C_out, C_in, 1, 1, 1),
                                minval=-bound, maxval=bound, dtype=jnp.float32)
    bias = jax.random.uniform(kb, (C_out,), minval=-bound, maxval=bound,
                              dtype=jnp.float32)
    gamma = jnp.ones((C_out,), jnp.float32)   # InstanceNorm3d affine weight init
    beta = jnp.zeros((C_out,), jnp.float32)   # InstanceNorm3d affine bias init
    return weight, bias, gamma, beta


if __name__ == "__main__":
    key = jax.random.PRNGKey(0)
    k1, k2, k3, k4 = jax.random.split(key, 4)

    # Test 1: lane-dense S (no padding), single spatial tile, batch parallel.
    N, C_in, C_out = 2, 4, 8
    D, H, W = 4, 4, 8                       # S = 128
    x = jax.random.normal(k1, (N, C_in, D, H, W), dtype=jnp.float32)
    weight, bias, gamma, beta = _make_params(k2, C_in, C_out)
    out = jax.block_until_ready(conv3d_norm_act(x, weight, bias, gamma, beta))
    ref = reference(x, weight, bias, gamma, beta)
    assert out.shape == (N, C_out, D, H, W)
    assert jnp.allclose(out, ref, atol=1e-4, rtol=1e-4), "mismatch vs reference (test 1)"

    # Test 2: non-128-multiple S (padding path) and multiple spatial tiles.
    N2, C_in2, C_out2 = 1, 4, 8
    D2, H2, W2 = 5, 6, 7                    # S = 210 -> padded to 256, 2 tiles of 128
    x2 = jax.random.normal(k3, (N2, C_in2, D2, H2, W2), dtype=jnp.float32)
    weight2, bias2, gamma2, beta2 = _make_params(k4, C_in2, C_out2)
    out2 = jax.block_until_ready(
        conv3d_norm_act(x2, weight2, bias2, gamma2, beta2, tile_s=128))
    ref2 = reference(x2, weight2, bias2, gamma2, beta2)
    assert out2.shape == (N2, C_out2, D2, H2, W2)
    assert jnp.allclose(out2, ref2, atol=1e-4, rtol=1e-4), "mismatch vs reference (test 2)"

    print("KERNEL_OK")
</pallas_src>

<mosaic_0001>
module attributes {stable_mosaic.version = 11 : i64} {
  func.func @_conv_in_lrelu_kernel(%arg0: i32, %arg1: i32, %arg2: i32, %arg3: memref<1x4x128xf32, #tpu.memory_space<vmem>>, %arg4: memref<8x4xf32, #tpu.memory_space<vmem>>, %arg5: memref<8x1xf32, #tpu.memory_space<vmem>>, %arg6: memref<8x1xf32, #tpu.memory_space<vmem>>, %arg7: memref<1x8x128xf32, #tpu.memory_space<vmem>>, %arg8: memref<8x1xf32, #tpu.memory_space<vmem>>, %arg9: memref<8x1xf32, #tpu.memory_space<vmem>>, %arg10: memref<8x1xf32, #tpu.memory_space<vmem>>, %arg11: memref<8x1xf32, #tpu.memory_space<vmem>>) attributes {dimension_semantics = [#tpu.dimension_semantics<parallel>, #tpu.dimension_semantics<arbitrary>, #tpu.dimension_semantics<arbitrary>], iteration_bounds = array<i64: 2, 2, 1>, scalar_prefetch = 0 : i64, scratch_operands = 4 : i64, tpu.core_type = #tpu.core_type<tc>, window_params = [{transform_indices = @transform_0, window_bounds = array<i64: 1, 4, 128>}, {pipeline_mode = #tpu.pipeline_mode<synchronous>, transform_indices = @transform_1, window_bounds = array<i64: 8, 4>}, {pipeline_mode = #tpu.pipeline_mode<synchronous>, transform_indices = @transform_2, window_bounds = array<i64: 8, 1>}, {pipeline_mode = #tpu.pipeline_mode<synchronous>, transform_indices = @transform_3, window_bounds = array<i64: 8, 1>}, {transform_indices = @transform_4, window_bounds = array<i64: 1, 8, 128>}]} {
    %c0 = arith.constant 0 : index
    %c0_0 = arith.constant 0 : index
    %0 = vector.load %arg4[%c0, %c0_0] : memref<8x4xf32, #tpu.memory_space<vmem>>, vector<8x4xf32>
    %c0_1 = arith.constant 0 : index
    %c0_2 = arith.constant 0 : index
    %c0_3 = arith.constant 0 : index
    %1 = vector.load %arg3[%c0_1, %c0_2, %c0_3] : memref<1x4x128xf32, #tpu.memory_space<vmem>>, vector<1x4x128xf32>
    %2 = vector.shape_cast %1 : vector<1x4x128xf32> to vector<4x128xf32>
    %cst = arith.constant dense<0.000000e+00> : vector<8x128xf32>
    %3 = tpu.matmul %0, %2, %cst {dimension_numbers = #tpu.dot_dimension_numbers<[1], [0], [0], [1], [0, 0, 1, 1], [], []>} : vector<8x4xf32>, vector<4x128xf32>, vector<8x128xf32> -> vector<8x128xf32>
    %c0_i32 = arith.constant 0 : i32
    %4 = arith.cmpi eq, %arg1, %c0_i32 : i32
    %5 = arith.extui %4 : i1 to i32
    %c0_i32_4 = arith.constant 0 : i32
    %6 = arith.cmpi ne, %5, %c0_i32_4 : i32
    scf.if %6 {
      %c0_i32_6 = arith.constant 0 : i32
      %10 = arith.cmpi eq, %arg2, %c0_i32_6 : i32
      %11 = arith.extui %10 : i1 to i32
      %c0_i32_7 = arith.constant 0 : i32
      %12 = arith.cmpi ne, %11, %c0_i32_7 : i32
      scf.if %12 {
        %cst_20 = arith.constant 0.000000e+00 : f32
        %27 = vector.broadcast %cst_20 : f32 to vector<8x1xf32>
        %c0_21 = arith.constant 0 : index
        %c0_22 = arith.constant 0 : index
        %28 = vector.load %arg8[%c0_21, %c0_22] : memref<8x1xf32, #tpu.memory_space<vmem>>, vector<8x1xf32>
        tpu.vector_store %arg8[%c0_21, %c0_22], %27 {strides = array<i32>} : memref<8x1xf32, #tpu.memory_space<vmem>>, vector<8x1xf32>,
        %cst_23 = arith.constant 0.000000e+00 : f32
        %29 = vector.broadcast %cst_23 : f32 to vector<8x1xf32>
        %c0_24 = arith.constant 0 : index
        %c0_25 = arith.constant 0 : index
        %30 = vector.load %arg9[%c0_24, %c0_25] : memref<8x1xf32, #tpu.memory_space<vmem>>, vector<8x1xf32>
        tpu.vector_store %arg9[%c0_24, %c0_25], %29 {strides = array<i32>} : memref<8x1xf32, #tpu.memory_space<vmem>>, vector<8x1xf32>,
      } else {
      }
      %c0_8 = arith.constant 0 : index
      %c0_9 = arith.constant 0 : index
      %13 = vector.load %arg8[%c0_8, %c0_9] : memref<8x1xf32, #tpu.memory_space<vmem>>, vector<8x1xf32>
      %cst_10 = arith.constant dense<0.000000e+00> : vector<8xf32>
      %14 = vector.multi_reduction <add>, %3, %cst_10 [1] : vector<8x128xf32> to vector<8xf32>
      %15 = vector.shape_cast %14 : vector<8xf32> to vector<8x1xf32>
      %16 = arith.addf %13, %15 : vector<8x1xf32>
      %c0_11 = arith.constant 0 : index
      %c0_12 = arith.constant 0 : index
      %17 = vector.load %arg8[%c0_11, %c0_12] : memref<8x1xf32, #tpu.memory_space<vmem>>, vector<8x1xf32>
      tpu.vector_store %arg8[%c0_11, %c0_12], %16 {strides = array<i32>} : memref<8x1xf32, #tpu.memory_space<vmem>>, vector<8x1xf32>,
      %c0_13 = arith.constant 0 : index
      %c0_14 = arith.constant 0 : index
      %18 = vector.load %arg9[%c0_13, %c0_14] : memref<8x1xf32, #tpu.memory_space<vmem>>, vector<8x1xf32>
      %19 = arith.mulf %3, %3 : vector<8x128xf32>
      %cst_15 = arith.constant dense<0.000000e+00> : vector<8xf32>
      %20 = vector.multi_reduction <add>, %19, %cst_15 [1] : vector<8x128xf32> to vector<8xf32>
      %21 = vector.shape_cast %20 : vector<8xf32> to vector<8x1xf32>
      %22 = arith.addf %18, %21 : vector<8x1xf32>
      %c0_16 = arith.constant 0 : index
      %c0_17 = arith.constant 0 : index
      %23 = vector.load %arg9[%c0_16, %c0_17] : memref<8x1xf32, #tpu.memory_space<vmem>>, vector<8x1xf32>
      tpu.vector_store %arg9[%c0_16, %c0_17], %22 {strides = array<i32>} : memref<8x1xf32, #tpu.memory_space<vmem>>, vector<8x1xf32>,
      %c0_i32_18 = arith.constant 0 : i32
      %24 = arith.cmpi eq, %arg2, %c0_i32_18 : i32
      %25 = arith.extui %24 : i1 to i32
      %c0_i32_19 = arith.constant 0 : i32
      %26 = arith.cmpi ne, %25, %c0_i32_19 : i32
      scf.if %26 {
        %c0_20 = arith.constant 0 : index
        %c0_21 = arith.constant 0 : index
        %27 = vector.load %arg8[%c0_20, %c0_21] : memref<8x1xf32, #tpu.memory_space<vmem>>, vector<8x1xf32>
        %cst_22 = arith.constant 7.812500e-03 : f32
        %28 = vector.broadcast %cst_22 : f32 to vector<8x1xf32>
        %29 = arith.mulf %27, %28 : vector<8x1xf32>
        %c0_23 = arith.constant 0 : index
        %c0_24 = arith.constant 0 : index
        %30 = vector.load %arg9[%c0_23, %c0_24] : memref<8x1xf32, #tpu.memory_space<vmem>>, vector<8x1xf32>
        %cst_25 = arith.constant 7.812500e-03 : f32
        %31 = vector.broadcast %cst_25 : f32 to vector<8x1xf32>
        %32 = arith.mulf %30, %31 : vector<8x1xf32>
        %33 = arith.mulf %29, %29 : vector<8x1xf32>
        %34 = arith.subf %32, %33 : vector<8x1xf32>
        %cst_26 = arith.constant 0.000000e+00 : f32
        %35 = vector.broadcast %cst_26 : f32 to vector<8x1xf32>
        %36 = arith.maximumf %34, %35 : vector<8x1xf32>
        %c0_27 = arith.constant 0 : index
        %c0_28 = arith.constant 0 : index
        %37 = vector.load %arg5[%c0_27, %c0_28] : memref<8x1xf32, #tpu.memory_space<vmem>>, vector<8x1xf32>
        %cst_29 = arith.constant 9.99999974E-6 : f32
        %38 = vector.broadcast %cst_29 : f32 to vector<8x1xf32>
        %39 = arith.addf %36, %38 : vector<8x1xf32>
        %40 = math.rsqrt %39 : vector<8x1xf32>
        %41 = arith.mulf %37, %40 : vector<8x1xf32>
        %c0_30 = arith.constant 0 : index
        %c0_31 = arith.constant 0 : index
        %42 = vector.load %arg10[%c0_30, %c0_31] : memref<8x1xf32, #tpu.memory_space<vmem>>, vector<8x1xf32>
        tpu.vector_store %arg10[%c0_30, %c0_31], %41 {strides = array<i32>} : memref<8x1xf32, #tpu.memory_space<vmem>>, vector<8x1xf32>,
        %c0_32 = arith.constant 0 : index
        %c0_33 = arith.constant 0 : index
        %43 = vector.load %arg6[%c0_32, %c0_33] : memref<8x1xf32, #tpu.memory_space<vmem>>, vector<8x1xf32>
        %44 = arith.mulf %41, %29 : vector<8x1xf32>
        %45 = arith.subf %43, %44 : vector<8x1xf32>
        %c0_34 = arith.constant 0 : index
        %c0_35 = arith.constant 0 : index
        %46 = vector.load %arg11[%c0_34, %c0_35] : memref<8x1xf32, #tpu.memory_space<vmem>>, vector<8x1xf32>
        tpu.vector_store %arg11[%c0_34, %c0_35], %45 {strides = array<i32>} : memref<8x1xf32, #tpu.memory_space<vmem>>, vector<8x1xf32>,
      } else {
      }
    } else {
    }
    %c1_i32 = arith.constant 1 : i32
    %7 = arith.cmpi eq, %arg1, %c1_i32 : i32
    %8 = arith.extui %7 : i1 to i32
    %c0_i32_5 = arith.constant 0 : i32
    %9 = arith.cmpi ne, %8, %c0_i32_5 : i32
    scf.if %9 {
      %c0_6 = arith.constant 0 : index
      %c0_7 = arith.constant 0 : index
      %10 = vector.load %arg10[%c0_6, %c0_7] : memref<8x1xf32, #tpu.memory_space<vmem>>, vector<8x1xf32>
      %11 = vector.broadcast %10 : vector<8x1xf32> to vector<8x128xf32>
      %12 = arith.mulf %3, %11 : vector<8x128xf32>
      %c0_8 = arith.constant 0 : index
      %c0_9 = arith.constant 0 : index
      %13 = vector.load %arg11[%c0_8, %c0_9] : memref<8x1xf32, #tpu.memory_space<vmem>>, vector<8x1xf32>
      %14 = vector.broadcast %13 : vector<8x1xf32> to vector<8x128xf32>
      %15 = arith.addf %12, %14 : vector<8x128xf32>
      %cst_10 = arith.constant 0.000000e+00 : f32
      %16 = vector.broadcast %cst_10 : f32 to vector<8x128xf32>
      %17 = arith.cmpf oge, %15, %16 : vector<8x128xf32>
      %cst_11 = arith.constant 0.00999999977 : f32
      %18 = vector.broadcast %cst_11 : f32 to vector<8x128xf32>
      %19 = arith.mulf %18, %15 : vector<8x128xf32>
      %20 = arith.select %17, %15, %19 : vector<8x128xi1>, vector<8x128xf32>
      %c0_12 = arith.constant 0 : index
      %c0_13 = arith.constant 0 : index
      %c0_14 = arith.constant 0 : index
      %21 = vector.load %arg7[%c0_12, %c0_13, %c0_14] : memref<1x8x128xf32, #tpu.memory_space<vmem>>, vector<1x8x128xf32>
      %22 = vector.shape_cast %21 : vector<1x8x128xf32> to vector<8x128xf32>
      %23 = vector.shape_cast %20 : vector<8x128xf32> to vector<1x8x128xf32>
      tpu.vector_store %arg7[%c0_12, %c0_13, %c0_14], %23 {strides = array<i32>} : memref<1x8x128xf32, #tpu.memory_space<vmem>>, vector<1x8x128xf32>,
    } else {
    }
    return
  }
  func.func @transform_0(%arg0: i32, %arg1: i32, %arg2: i32) -> (i32, i32, i32) {
    %c0_i32 = arith.constant 0 : i32
    %c0_i32_0 = arith.constant 0 : i32
    return %arg0, %c0_i32, %arg2 : i32, i32, i32
  }
  func.func @transform_1(%arg0: i32, %arg1: i32, %arg2: i32) -> (i32, i32) {
    %c0_i32 = arith.constant 0 : i32
    %c0_i32_0 = arith.constant 0 : i32
    %c0_i32_1 = arith.constant 0 : i32
    return %c0_i32, %c0_i32_0 : i32, i32
  }
  func.func @transform_2(%arg0: i32, %arg1: i32, %arg2: i32) -> (i32, i32) {
    %c0_i32 = arith.constant 0 : i32
    %c0_i32_0 = arith.constant 0 : i32
    %c0_i32_1 = arith.constant 0 : i32
    return %c0_i32, %c0_i32_0 : i32, i32
  }
  func.func @transform_3(%arg0: i32, %arg1: i32, %arg2: i32) -> (i32, i32) {
    %c0_i32 = arith.constant 0 : i32
    %c0_i32_0 = arith.constant 0 : i32
    %c0_i32_1 = arith.constant 0 : i32
    return %c0_i32, %c0_i32_0 : i32, i32
  }
  func.func @transform_4(%arg0: i32, %arg1: i32, %arg2: i32) -> (i32, i32, i32) {
    %0 = arith.muli %arg1, %arg2 : i32
    %c0_i32 = arith.constant 0 : i32
    %c0_i32_0 = arith.constant 0 : i32
    return %arg0, %c0_i32, %0 : i32, i32, i32
  }
}

</mosaic_0001>

<bundles_post_ra>
// kernel: tpu_custom_call.1
= control target key start
LH: loop header
LB: loop body
LE: loop exit
PB: predicated region body
PF: predicated region fallthrough
CT: control target
= control target key end

     0   :  { %9 = vsyncpa [#allocation7], 0  ;;  %s785_s0 = inlined_call_operand.vmem [shape: f32[2,4,128], index: 0, kind: input, shape index: {}]   ;;  %s786_s1 = inlined_call_operand.vmem [shape: f32[8,4], index: 1, kind: input, shape index: {}]   ;;  %s787_s2 = inlined_call_operand.vmem [shape: f32[8,1], index: 2, kind: input, shape index: {}]   ;;  %s788_s3 = inlined_call_operand.vmem [shape: f32[8,1], index: 3, kind: input, shape index: {}]   ;;  %s789_s4 = inlined_call_operand.hbm [shape: f32[2,8,128], index: 4, kind: output, shape index: {}]  }
   0x1   :  { %11 = vsyncpa [#allocation7 + $0x1], 0  ;;  %s640_s15 = smov 0   ;;  %s642_s16 = smov 0  }
   0x2   :  { %s644_s17 = smov 0   ;;  %s646_s18 = smov 0  }
   0x3   :  { %s648_s19 = smov 0   ;;  %s650_s20 = smov 0  }
   0x4   :  { %s652_s21 = smov 0   ;;  %s654_s22 = smov 0  }
   0x5 LB: > { %s426_s23 = sadd.s32 4294967295, %s611_s22   ;;  %s427_s24 = sadd.s32 4294967294, %s611_s22   ;;  %s611_s22 = sphi %s654_s22, %s17_s22   ;;  %s607_s21 = sphi %s652_s21, %s798_s21   ;;  %s603_s20 = sphi %s650_s20, %s797_s20   ;;  %s599_s19 = sphi %s648_s19, %s796_s19   ;;  %s595_s18 = sphi %s646_s18, %s795_s18   ;;  %s591_s17 = sphi %s644_s17, %s794_s17   ;;  %s587_s16 = sphi %s642_s16, %s793_s16   ;;  %s583_s15 = sphi %s640_s15, %s792_s15  }
   0x6   : > { %s32_s25 = sadd.s32 1, %s603_s20  ;;  %s36_s26 = sadd.s32 1, %s607_s21 }
   0x7   : > { %p34_p0 = scmp.ge.s32.totalorder %s32_s25, 2  ;;  %p148_p1 = scmp.ne.s32.totalorder %s591_s17, %s587_s16 }
   0x8   : > { %p149_p2 = scmp.eq.s32.totalorder %s426_s23, 3  ;;  %p154_p4 = scmp.ne.s32.totalorder %s587_s16, %s583_s15 }
   0x9   : > { %s800_s25 = smov (%p34_p0, %s32_s25), 0  ;;  %s802_s26 = smov (!%p34_p0, %s36_s26), %s607_s21 }
   0xa   : > { %p689_p3 = por %p149_p2, %p148_p1  ;;  %p38_p5 = scmp.ge.s32.totalorder %s802_s26, 2 }
   0xb   : > { %p155_p6 = scmp.eq.s32.totalorder %s427_s24, 3  ;;  %p430_p7 = scmp.ge.s32.totalorder %s611_s22, 1 }
   0xc   : > { %p192_p8 = scmp.lt.s32.totalorder %s611_s22, 5  ;;  %s804_s26 = smov (%p38_p5, %s802_s26), 0 }
   0xd   : > { %p699_p9 = por %p155_p6, %p154_p4  ;;  %s133_s29 = ssub.s32 %s607_s21, %s804_s26 }
   0xe   : > { %p193_p10 = pnand %p430_p7, %p192_p8  ;;  %s138_s30 = sadd.s32 1, %s591_s17 }
   0xf   : > { %p136_p11 = scmp.eq.s32.totalorder %s133_s29, 0  ;;  %s217_s6 = sand.u32 (!%p193_p10), 1, %s587_s16  }
  0x10   : > { %196 = sbr.rel (%p193_p10) target bundleno = 473 (0x1d9), region = 36  ;;  %p220_p12 = scmp.lt.s32.totalorder (!%p193_p10), %s599_s19, 1 }
  0x11   : > { %s707_s5 = scalar_select %p136_p11, %s591_s17, %s138_s30  }
  0x12   : > { %s713_s7 = sshll.u32 (!%p193_p10), %s217_s6, 3  ;;  %p435_p13 = scmp.ne.s32.totalorder (!%p193_p10), %s595_s18, 0 }
  0x13   : > { %s219_s23 = scalar_lea.vmem (!%p193_p10), [#allocation6], %s713_s7 }
  0x15   : > { %s221_s8 = scalar_select %p220_p12, %s599_s19, 1  ;;  %vm234_vm0 = vcmask 1043456   ;;  %v228_v0 = vld [vmem:[%s786_s1] sm:$0xff]  ;;  %vm230_vm1 = vcmask 31744  }
  0x17   : > { %s432_s9 = sshll.u32 %s221_s8, 2 }
  0x18   : > { %s226_s12 = scalar_lea.vmem %s785_s0, %s432_s9 }
  0x19   : > { %v229_v1 = vld [vmem:[%s226_s12] sm:$0xf] }
  0x1a   : > { %433 = vmatpush.msk.msra.mxu0 %vm234_vm0, %v229_v1 }
  0x1b   : > { %434 = vmatmul.msk.f32.vlgmr.msra.gmra.mxu0 %vm230_vm1, %v228_v0 }
  0x94   : > { %261 = sbr.rel (%p435_p13) target bundleno = 320 (0x140), region = 40 }
  0x98   : > { %v255_v2 = vpop.f32.mrf.mxu0 }
  0x99   : > { %270 = vadd.xlane.f32.xlu0 %v255_v2  ;;  %v276_v3 = vmul.f32 %v255_v2, %v255_v2  ;;  %vm266_vm2 = vcmask 7168   ;;  %v613_v4 = vmov 0.0   ;;  %v291_v24 = vld [vmem:[%s787_s2] sm:$0xff] }
  0x9a   : > { %267 = vst.msk [vmem:[#allocation2] sm:$0xff] %vm266_vm2, %v613_v4  ;;  %v305_v28 = vld [vmem:[%s788_s3] sm:$0xff] }
  0x9b   : > { %268 = vst.msk [vmem:[#allocation3] sm:$0xff] %vm266_vm2, %v613_v4 }
  0xa1   : > { %277 = vadd.xlane.f32.xlu0 %v276_v3  ;;  %v269_v5 = vld [vmem:[#allocation2] sm:$0xff] }
  0xa2   : > { %v275_v8 = vld [vmem:[#allocation3] sm:$0xff] }
 0x10c   : > { %v271_v6 = vpop.xlane.xlu0 %270 }
 0x10d   : > { %v272_v7 = vadd.f32 %v271_v6, %v269_v5 }
 0x10f   : > { %274 = vst.msk [vmem:[#allocation2] sm:$0xff] %vm266_vm2, %v272_v7 }
 0x114   : > { %v278_v9 = vpop.xlane.xlu0 %277 }
 0x115   : > { %v279_v10 = vadd.f32 %v278_v9, %v275_v8 }
 0x116   : > { %v284_v11 = vld [vmem:[#allocation2] sm:$0xff] }
 0x117   : > { %280 = vst.msk [vmem:[#allocation3] sm:$0xff] %vm266_vm2, %v279_v10  ;;  %v285_v12 = vmul.f32 0.0078125, %v284_v11 }
 0x119   : > { %v288_v14 = vmul.f32 %v285_v12, %v285_v12 }
 0x11e   : > { %v286_v13 = vld [vmem:[#allocation3] sm:$0xff] }
 0x11f   : > { %v287_v15 = vmul.f32 0.0078125, %v286_v13 }
 0x121   : > { %v289_v16 = vsub.f32 %v287_v15, %v288_v14 }
 0x123   : > { %v290_v17 = vmax.f32 %v289_v16, 0.0 }
 0x125   : > { %v292_v18 = vadd.f32 1e-05, %v290_v17 }
 0x127   : > { %514 = vrsqrt.f32 %v292_v18  ;;  %vm299_vm4 = vweird.f32 %v292_v18 }
 0x12d   : > { %v515_v19 = vpop.eup %514 }
 0x12e   : > { %v294_v20 = vmul.f32 %v515_v19, %v292_v18  ;;  %vm300_vm3 = vweird.f32 %v515_v19 }
 0x12f   : > { %vm301_vm5 = vmor %vm299_vm4, %vm300_vm3 }
 0x130   : > { %v295_v21 = vmul.f32 %v515_v19, %v294_v20 }
 0x132   : > { %v296_v22 = vmul.f32 0.5, %v295_v21 }
 0x134   : > { %v297_v23 = vsub.f32 1.5, %v296_v22 }
 0x136   : > { %v298_v25 = vmul.f32 %v515_v19, %v297_v23 }
 0x138   : > { %v302_v26 = vsel %vm301_vm5, %v515_v19, %v298_v25 }
 0x139   : > { %v303_v27 = vmul.f32 %v302_v26, %v291_v24 }
 0x13b   : > { %304 = vst.msk [vmem:[#allocation4] sm:$0xff] %vm266_vm2, %v303_v27  ;;  %v306_v29 = vmul.f32 %v303_v27, %v285_v12 }
 0x13d   : > { %v307_v30 = vsub.f32 %v305_v28, %v306_v29 }
 0x13f   : > { %308 = vst.msk [vmem:[#allocation5] sm:$0xff] %vm266_vm2, %v307_v30 }
 0x140 PF: > { %p436_p0 = scmp.ne.s32.totalorder %s595_s18, 1 }
 0x142   : > { %312 = sbr.rel (%p436_p0) target bundleno = 458 (0x1ca), region = 52 }
 0x147   : > { %v313_v31 = vld [vmem:[#allocation4] sm:$0xff]  ;;  %v614_v32 = vmov 0   ;;  %v320_v33 = vld [vmem:[#allocation5] sm:$0xff] }
 0x148   : > { %516 = vset.pattern.permute.xlu0 %v614_v32 }
 0x149   : > { %316 = vperm.xlu0 %516, %v313_v31  }
 0x151   : > { %323 = vperm.xlu0 %516, %v320_v33  }
 0x1bb   : > { %v317_v34 = vpop.permute.xlu0 %316 }
 0x1bc   : > { %v319_v35 = vmul.f32 %v317_v34, %v255_v2 }
 0x1c3   : > { %v324_v36 = vpop.permute.xlu0 %323 }
 0x1c4   : > { %v326_v37 = vadd.f32 %v324_v36, %v319_v35 }
 0x1c6   : > { %vm327_vm6 = vcmp.ge.f32.partialorder %v326_v37, 0.0  ;;  %v328_v38 = vmul.f32 0.01, %v326_v37 }
 0x1c8   : > { %v329_v39 = vsel %vm327_vm6, %v326_v37, %v328_v38 }
 0x1c9   : > { %330 = vst [vmem:[%s219_s23] sm:$0xff] %v329_v39 }
 0x1ca PF: > { %s438_s18 = sshll.u32 %s599_s19, 3  ;;  %s346_s12 = sshll.u32 %s219_s23, 4  ;;  %s347_s12 = int_to_ptr.vmem [resolvable:$true] %s346_s12 }
 0x1cb   : > { %s344_s11 = scalar_lea.hbm %s789_s4, %s438_s18  ;;  %s332_s14 = scalar_lea.sflag [#allocation7], %s217_s6 }
 0x1cc   : > { %s348_s13 = sshll.u32 %s344_s11, 4  ;;  %s537_s8 = scalar_lea.hbm %s789_s4, 16  ;;  %s349_s13 = int_to_ptr.hbm [resolvable:$true] %s348_s13 }
 0x1cd   : > { %s531_s24 = sshra.s32 %s349_s13, 4  ;;  %s532_s24 = int_to_ptr.hbm [resolvable:$true] %s531_s24 }
 0x1ce   : > { %s533_s29 = scalar_lea.hbm %s532_s24, 8  ;;  %p538_p5 = scmp.lt.s32.totalorder %s532_s24, %s789_s4 }
 0x1cf   : > { %p534_p1 = scmp.ne.s32.totalorder %s532_s24, %s533_s29  ;;  %p539_p6 = scmp.lt.s32.totalorder %s537_s8, %s533_s29 }
 0x1d1   : > { %p535_p2 = pnand %p534_p1, %p689_p3  ;;  %p540_p7 = por %p539_p6, %p538_p5 }
 0x1d3   : > { %p536_p4 = pneg %p535_p2 }
 0x1d5   : > { %p541_p8 = pnand %p540_p7, %p536_p4 }
 0x1d7   : > { %544 = shalt.err (!%p541_p8)
}
 0x1d8   : > { %441 = dma.vmem_to_hbm [thread:$0]  (%p689_p3), %s347_s12, 128, %s349_s13, %s332_s14  }
 0x1d9 PF: > { %p447_p10 = scmp.ge.s32.totalorder %s611_s22, 2  ;;  %s360_s6 = sand.u32 1, %s583_s15  }
 0x1da   : > { %s361_s7 = scalar_lea.sflag [#allocation7], %s360_s6 }
 0x1db   : > { %p444_p11 = pnand %p447_p10, %p699_p9 }
 0x1dd   : > { %p445_p12 = pneg %p444_p11 }
 0x1df   : > { %578 = dma.done.wait (%p445_p12), %s361_s7, 128  }
 0x1e0   : > { %580 = vsyncadd (%p445_p12), %s361_s7, 4294967168  ;;  %s17_s22 = sadd.s32 1, %s611_s22   ;;  %s792_s15 = smov %s587_s16 }
 0x1e1   : > { %p14_p13 = scmp.ge.s32.totalorder %s17_s22, 6   ;;  %s793_s16 = smov %s591_s17 }
 0x1e2   : > { %s794_s17 = smov %s707_s5  ;;  %s795_s18 = smov %s603_s20 }
 0x1e3   : > { %s796_s19 = smov %s607_s21  ;;  %s797_s20 = smov %s800_s25 }
 0x1e4   : > { %s798_s21 = smov %s804_s26  ;;  %16 = sbr.rel (!%p14_p13) target bundleno = 5 (0x5), region = 87 }
 0x1e9   :  { %367 = vsyncpa [#allocation7], 1 }
 0x1ea   :  { %369 = vsyncpa [#allocation7 + $0x1], 1 }

</bundles_post_ra>
